<compile_context>
chip_gen: v7x
topology: tpu7x:2x2x1
jax: 0.10.0
libtpu: 0.0.40
codegen_flags: <defaults>
</compile_context>

<pallas_src>
import math

import jax
import jax.numpy as jnp
from jax.experimental import pallas as pl
from jax.experimental.pallas import tpu as pltpu


# ---------------------------------------------------------------------------- config
CFG = dict(
    Cin=4, Cout=64, H=16, W=16,          # conv_in (real SDXL: 4 -> 320)
    vocab=1000,
    enc1=dict(width=32, heads=2, layers=2, mlp=128, max_pos=16,
              act='quick_gelu', bos=1, eos=2, pad=2),          # CLIP-L-like (pad == eos)
    enc2=dict(width=64, heads=4, layers=2, mlp=256, max_pos=16,
              act='gelu', bos=1, eos=2, pad=0, proj=64),       # OpenCLIP-bigG-like
    time_channels=32,        # time_proj sinusoid width   (real 320)
    add_time_channels=8,     # per add_time_id sinusoid   (real 256)
    temb_dim=128,            # time embedding dim         (real 1280)
    num_upsamplers=2,
)

MATMUL_DTYPE = jnp.float32   # set to jnp.bfloat16 on v6e/v7x; accumulation stays f32


# ---------------------------------------------------------------------------- helpers
def _idx0(ndim):
    return lambda *_: (0,) * ndim


def _rep_spec(a):
    """Full-array block, replicated across the grid."""
    return pl.BlockSpec(a.shape, _idx0(a.ndim))


def _mm(a, b):
    return jnp.dot(a.astype(MATMUL_DTYPE), b.astype(MATMUL_DTYPE),
                   preferred_element_type=jnp.float32)


def _mm_nt(a, b):
    """a @ b.T (contract the last dims of both)."""
    return jax.lax.dot_general(a.astype(MATMUL_DTYPE), b.astype(MATMUL_DTYPE),
                               (((1,), (1,)), ((), ())),
                               preferred_element_type=jnp.float32)


def _ln(x, g, b, eps=1e-5):
    mu = jnp.mean(x, axis=-1, keepdims=True)
    xc = x - mu
    var = jnp.mean(xc * xc, axis=-1, keepdims=True)
    return xc * jax.lax.rsqrt(var + eps) * g + b


def sinusoidal_embedding(t, dim):
    """diffusers Timesteps(dim, flip_sin_to_cos=True, downscale_freq_shift=0): [cos, sin]."""
    half = dim // 2
    freqs = jnp.exp(-math.log(10000.0) * jnp.arange(half, dtype=jnp.float32) / half)
    args = t.astype(jnp.float32)[:, None] * freqs[None, :]
    return jnp.concatenate([jnp.cos(args), jnp.sin(args)], axis=-1)


def preprocess_token_ids(ids, bos, eos, pad):
    """bos + ids + pad, then replace the first pad with eos (single chunk only)."""
    B = ids.shape[0]
    chunk = jnp.concatenate(
        [jnp.full((B, 1), bos, ids.dtype), ids, jnp.full((B, 1), pad, ids.dtype)], axis=-1)
    first_pad = jnp.argmax((chunk == pad).astype(jnp.int32), axis=-1)
    return chunk.at[jnp.arange(B), first_pad].set(eos)


# ---------------------------------------------------------------------------- kernels
def transformer_layer_pallas(x, lp, *, heads, act):
    """One fused pre-LN CLIP transformer block per batch element (grid over B, parallel)."""
    B, L, D = x.shape
    dh = D // heads
    scale = 1.0 / math.sqrt(dh)

    def kernel(x_ref, l1g, l1b, wq, bq, wk, bk, wv, bv, wo, bo,
               l2g, l2b, w1, b1, w2, b2, o_ref):
        xx = x_ref[0]                                               # (L, D)
        # ---- self attention ----
        h = _ln(xx, l1g[...], l1b[...])
        row = jax.lax.broadcasted_iota(jnp.int32, (L, L), 0)
        col = jax.lax.broadcasted_iota(jnp.int32, (L, L), 1)
        causal = jnp.where(col <= row, 0.0, -1e9)
        acc = jnp.zeros((L, D), jnp.float32)
        for hd in range(heads):                                     # heads static & small
            q = _mm(h, wq[hd]) + bq[hd]
            k = _mm(h, wk[hd]) + bk[hd]
            v = _mm(h, wv[hd]) + bv[hd]
            s = _mm_nt(q, k) * scale + causal                       # (L, L)
            m = jnp.max(s, axis=-1, keepdims=True)
            p = jnp.exp(s - m)
            denom = jnp.sum(p, axis=-1, keepdims=True)
            p = p * pl.reciprocal(denom, approx=True)               # EUP reciprocal
            acc = acc + _mm(_mm(p, v), wo[hd])                      # fold head merge into o-proj
        xx = xx + acc + bo[...]
        # ---- MLP ----
        h2 = _ln(xx, l2g[...], l2b[...])
        m1 = _mm(h2, w1[...]) + b1[...]
        if act == 'quick_gelu':
            m1 = m1 * jax.nn.sigmoid(1.702 * m1)
        else:
            m1 = jax.nn.gelu(m1, approximate=True)   # TODO(synk): exact erf GELU
        xx = xx + _mm(m1, w2[...]) + b2[...]
        o_ref[0] = xx

    args = [x, lp['ln1_g'], lp['ln1_b'], lp['wq'], lp['bq'], lp['wk'], lp['bk'],
            lp['wv'], lp['bv'], lp['wo'], lp['bo'], lp['ln2_g'], lp['ln2_b'],
            lp['w1'], lp['b1'], lp['w2'], lp['b2']]
    in_specs = [pl.BlockSpec((1, L, D), lambda b: (b, 0, 0))] + [_rep_spec(a) for a in args[1:]]
    return pl.pallas_call(
        kernel,
        out_shape=jax.ShapeDtypeStruct((B, L, D), jnp.float32),
        grid=(B,),
        in_specs=in_specs,
        out_specs=pl.BlockSpec((1, L, D), lambda b: (b, 0, 0)),
        compiler_params=pltpu.CompilerParams(dimension_semantics=("parallel",)),
    )(*args)


def pool_project_pallas(x_eos, g, b, wproj):
    """Fused final LayerNorm (at the eos token) + text_projection."""
    B, D = x_eos.shape
    P = wproj.shape[1]

    def kernel(x_ref, g_ref, b_ref, w_ref, o_ref):
        h = _ln(x_ref[...], g_ref[...], b_ref[...])
        o_ref[...] = _mm(h, w_ref[...])

    args = (x_eos, g, b, wproj)
    return pl.pallas_call(
        kernel,
        out_shape=jax.ShapeDtypeStruct((B, P), jnp.float32),
        grid=(1,),
        in_specs=[_rep_spec(a) for a in args],
        out_specs=pl.BlockSpec((B, P), _idx0(2)),
    )(*args)


def mlp_silu_pallas(x, w1, b1, w2, b2, add=None):
    """Fused Linear -> SiLU -> Linear (+ optional residual add) — TimestepEmbedding shape."""
    B = x.shape[0]
    N = w2.shape[1]
    has_add = add is not None

    def kernel(*refs):
        x_ref, w1r, b1r, w2r, b2r = refs[:5]
        a_ref = refs[5] if has_add else None
        o_ref = refs[-1]
        h = _mm(x_ref[...], w1r[...]) + b1r[...]
        h = h * jax.nn.sigmoid(h)
        y = _mm(h, w2r[...]) + b2r[...]
        if has_add:
            y = y + a_ref[...]
        o_ref[...] = y

    args = [x, w1, b1, w2, b2] + ([add] if has_add else [])
    return pl.pallas_call(
        kernel,
        out_shape=jax.ShapeDtypeStruct((B, N), jnp.float32),
        grid=(1,),
        in_specs=[_rep_spec(a) for a in args],
        out_specs=pl.BlockSpec((B, N), _idx0(2)),
    )(*args)


def conv_in_pallas(x_nchw, w, b, *, tile=128):
    """3x3 / stride 1 / pad 1 conv as 9 accumulated matmuls inside one kernel.

    Cin is tiny (4), so the 9-tap stack built in plain JAX is negligible glue; the wide
    (Cout) output is produced lane-dense in (B, spatial-tile) parallel grid steps.
    TODO(synk): for wide-Cin convs, generate the taps in-kernel from one padded block instead.
    """
    B, Cin, H, W = x_nchw.shape
    Cout = w.shape[-1]
    L = H * W
    x = jnp.transpose(x_nchw, (0, 2, 3, 1)).astype(jnp.float32)            # NHWC glue
    xp = jnp.pad(x, ((0, 0), (1, 1), (1, 1), (0, 0)))
    taps = jnp.stack([xp[:, ky:ky + H, kx:kx + W, :]
                      for ky in range(3) for kx in range(3)], axis=1)
    taps = taps.reshape(B, 9, L, Cin)
    TS = tile if L % tile == 0 else L

    def kernel(t_ref, w_ref, b_ref, o_ref):
        acc = jnp.zeros((TS, Cout), jnp.float32)
        for t in range(9):
            acc = acc + _mm(t_ref[0, t], w_ref[t])
        o_ref[0] = acc + b_ref[...]

    out = pl.pallas_call(
        kernel,
        out_shape=jax.ShapeDtypeStruct((B, L, Cout), jnp.float32),
        grid=(B, L // TS),
        in_specs=[
            pl.BlockSpec((1, 9, TS, Cin), lambda bb, mm: (bb, 0, mm, 0)),
            pl.BlockSpec((9, Cin, Cout), lambda bb, mm: (0, 0, 0)),
            pl.BlockSpec((1, Cout), lambda bb, mm: (0, 0)),
        ],
        out_specs=pl.BlockSpec((1, TS, Cout), lambda bb, mm: (bb, mm, 0)),
        compiler_params=pltpu.CompilerParams(dimension_semantics=("parallel", "parallel")),
    )(taps, w, b)
    return jnp.transpose(out.reshape(B, H, W, Cout), (0, 3, 1, 2))          # back to NCHW


# ---------------------------------------------------------------------------- text encoder
def clip_text_encoder(ids, p, ec, *, need_pooled):
    """Toy CLIP text transformer. Returns (hidden_states[-2], pooled-projection or None)."""
    num_layers = len(p['layers'])
    x = p['tok_emb'][ids] + p['pos_emb'][None, :ids.shape[1], :]            # gather glue
    # hidden_states[-2] only needs the first num_layers-1 blocks (clip_skip=None).
    n_run = num_layers if need_pooled else num_layers - 1
    penultimate = x
    for l in range(n_run):
        if l == num_layers - 1:
            penultimate = x
        x = transformer_layer_pallas(x, p['layers'][l], heads=ec['heads'], act=ec['act'])
    if not need_pooled:
        return x, None
    B = ids.shape[0]
    eos_pos = jnp.argmax((ids == ec['eos']).astype(jnp.int32), axis=-1)
    x_eos = x[jnp.arange(B), eos_pos]                                       # gather glue
    pooled = pool_project_pallas(x_eos, p['final_g'], p['final_b'], p['text_proj'])
    return penultimate, pooled


# ---------------------------------------------------------------------------- model forward
def initial_layer_forward(inputs, params, cfg):
    sample, timestep, input_ids, input_ids_2, add_time_ids = inputs
    B = sample.shape[0]

    up_factor = 2 ** cfg['num_upsamplers']
    forward_upsample_size = jnp.asarray(
        any(int(d) % up_factor != 0 for d in sample.shape[-2:]))

    # ---- text conditioning ----
    e1, e2 = cfg['enc1'], cfg['enc2']
    ids1 = preprocess_token_ids(input_ids, e1['bos'], e1['eos'], e1['pad'])
    ids2 = preprocess_token_ids(input_ids_2, e2['bos'], e2['eos'], e2['pad'])
    hs1, _ = clip_text_encoder(ids1, params['enc1'], e1, need_pooled=False)
    hs2, pooled = clip_text_encoder(ids2, params['enc2'], e2, need_pooled=True)
    encoder_hidden_states = jnp.concatenate([hs1, hs2], axis=-1)

    # ---- time embedding + added-condition embedding (emb + aug_emb fused into 2nd kernel) ----
    t_emb = sinusoidal_embedding(timestep, cfg['time_channels'])
    emb = mlp_silu_pallas(t_emb, params['time_w1'], params['time_b1'],
                          params['time_w2'], params['time_b2'])
    time_ids_emb = sinusoidal_embedding(add_time_ids.reshape(-1),
                                        cfg['add_time_channels']).reshape(B, -1)
    add_embeds = jnp.concatenate([pooled, time_ids_emb], axis=-1)
    emb = mlp_silu_pallas(add_embeds, params['add_w1'], params['add_b1'],
                          params['add_w2'], params['add_b2'], add=emb)
    # time_embed_act is None and encoder_hid_proj is None for SDXL -> nothing more to do.

    # ---- conv_in ----
    sample_out = conv_in_pallas(sample, params['conv_w'], params['conv_b'])

    down_block_res_samples = (sample_out,)
    return (sample_out, timestep, emb, encoder_hidden_states,
            *down_block_res_samples, forward_upsample_size)


# ---------------------------------------------------------------------------- params
def init_params(key, cfg):
    keys = iter(jax.random.split(key, 256))

    def w(shape, scale=0.08):
        return (scale * jax.random.normal(next(keys), shape)).astype(jnp.float32)

    def affine(n):
        g = (1.0 + 0.05 * jax.random.normal(next(keys), (1, n))).astype(jnp.float32)
        b = (0.05 * jax.random.normal(next(keys), (1, n))).astype(jnp.float32)
        return g, b

    def encoder_params(ec, with_projection):
        D, F, Hh = ec['width'], ec['mlp'], ec['heads']
        dh = D // Hh
        p = {'tok_emb': w((cfg['vocab'], D), 0.02),
             'pos_emb': w((ec['max_pos'], D), 0.02),
             'layers': []}
        for _ in range(ec['layers']):
            ln1_g, ln1_b = affine(D)
            ln2_g, ln2_b = affine(D)
            p['layers'].append({
                'ln1_g': ln1_g, 'ln1_b': ln1_b,
                'wq': w((Hh, D, dh)), 'bq': w((Hh, 1, dh), 0.02),
                'wk': w((Hh, D, dh)), 'bk': w((Hh, 1, dh), 0.02),
                'wv': w((Hh, D, dh)), 'bv': w((Hh, 1, dh), 0.02),
                'wo': w((Hh, dh, D)), 'bo': w((1, D), 0.02),
                'ln2_g': ln2_g, 'ln2_b': ln2_b,
                'w1': w((D, F)), 'b1': w((1, F), 0.02),
                'w2': w((F, D)), 'b2': w((1, D), 0.02),
            })
        if with_projection:
            p['final_g'], p['final_b'] = affine(D)
            p['text_proj'] = w((D, ec['proj']))
        return p

    TE = cfg['temb_dim']
    add_in = cfg['enc2']['proj'] + 6 * cfg['add_time_channels']
    return {
        'enc1': encoder_params(cfg['enc1'], False),
        'enc2': encoder_params(cfg['enc2'], True),
        'time_w1': w((cfg['time_channels'], TE)), 'time_b1': w((1, TE), 0.02),
        'time_w2': w((TE, TE)), 'time_b2': w((1, TE), 0.02),
        'add_w1': w((add_in, TE)), 'add_b1': w((1, TE), 0.02),
        'add_w2': w((TE, TE)), 'add_b2': w((1, TE), 0.02),
        'conv_w': w((9, cfg['Cin'], cfg['Cout'])), 'conv_b': w((1, cfg['Cout']), 0.02),
    }


# ---------------------------------------------------------------------------- pure-JAX reference
def reference_forward(inputs, params, cfg):
    sample, timestep, input_ids, input_ids_2, add_time_ids = inputs
    B = sample.shape[0]
    up_factor = 2 ** cfg['num_upsamplers']
    fus = jnp.asarray(any(int(d) % up_factor != 0 for d in sample.shape[-2:]))

    def ln(x, g, b, eps=1e-5):
        m = x.mean(-1, keepdims=True)
        v = ((x - m) ** 2).mean(-1, keepdims=True)
        return (x - m) / jnp.sqrt(v + eps) * g + b

    def layer(x, lp, heads, act):
        L, D = x.shape[-2:]
        dh = D // heads
        h = ln(x, lp['ln1_g'], lp['ln1_b'])
        q = jnp.einsum('bld,hde->bhle', h, lp['wq']) + lp['bq'][None]
        k = jnp.einsum('bld,hde->bhle', h, lp['wk']) + lp['bk'][None]
        v = jnp.einsum('bld,hde->bhle', h, lp['wv']) + lp['bv'][None]
        mask = jnp.where(jnp.arange(L)[None, :] <= jnp.arange(L)[:, None], 0.0, -1e9)
        s = jnp.einsum('bhqe,bhke->bhqk', q, k) / math.sqrt(dh) + mask
        p = jax.nn.softmax(s, axis=-1)
        o = jnp.einsum('bhqk,bhke->bhqe', p, v)
        x = x + jnp.einsum('bhle,hed->bld', o, lp['wo']) + lp['bo']
        h2 = ln(x, lp['ln2_g'], lp['ln2_b'])
        m1 = h2 @ lp['w1'] + lp['b1']
        m1 = m1 * jax.nn.sigmoid(1.702 * m1) if act == 'quick_gelu' \
            else jax.nn.gelu(m1, approximate=True)
        return x + m1 @ lp['w2'] + lp['b2']

    def encoder(ids, p, ec, need_pooled):
        x = p['tok_emb'][ids] + p['pos_emb'][None, :ids.shape[1], :]
        hidden_states = [x]
        for lp in p['layers']:
            x = layer(x, lp, ec['heads'], ec['act'])
            hidden_states.append(x)
        embeds = hidden_states[-2]
        if not need_pooled:
            return embeds, None
        last = ln(x, p['final_g'], p['final_b'])
        eos_pos = jnp.argmax((ids == ec['eos']).astype(jnp.int32), axis=-1)
        pooled = last[jnp.arange(B), eos_pos] @ p['text_proj']
        return embeds, pooled

    e1, e2 = cfg['enc1'], cfg['enc2']
    ids1 = preprocess_token_ids(input_ids, e1['bos'], e1['eos'], e1['pad'])
    ids2 = preprocess_token_ids(input_ids_2, e2['bos'], e2['eos'], e2['pad'])
    hs1, _ = encoder(ids1, params['enc1'], e1, False)
    hs2, pooled = encoder(ids2, params['enc2'], e2, True)
    ehs = jnp.concatenate([hs1, hs2], axis=-1)

    def mlp(x, w1, b1, w2, b2):
        h = x @ w1 + b1
        h = h * jax.nn.sigmoid(h)
        return h @ w2 + b2

    t_emb = sinusoidal_embedding(timestep, cfg['time_channels'])
    emb = mlp(t_emb, params['time_w1'], params['time_b1'], params['time_w2'], params['time_b2'])
    tid = sinusoidal_embedding(add_time_ids.reshape(-1),
                               cfg['add_time_channels']).reshape(B, -1)
    aug = mlp(jnp.concatenate([pooled, tid], axis=-1),
              params['add_w1'], params['add_b1'], params['add_w2'], params['add_b2'])
    emb = emb + aug

    x = jnp.transpose(sample, (0, 2, 3, 1)).astype(jnp.float32)
    H, W, Cin = x.shape[1], x.shape[2], x.shape[3]
    xp = jnp.pad(x, ((0, 0), (1, 1), (1, 1), (0, 0)))
    taps = jnp.stack([xp[:, ky:ky + H, kx:kx + W, :]
                      for ky in range(3) for kx in range(3)], axis=1).reshape(B, 9, H * W, Cin)
    conv = jnp.einsum('btlc,tco->blo', taps, params['conv_w']) + params['conv_b']
    sample_out = jnp.transpose(conv.reshape(B, H, W, -1), (0, 3, 1, 2))

    return (sample_out, timestep, emb, ehs, sample_out, fus)


# ---------------------------------------------------------------------------- main
if __name__ == "__main__":
    cfg = CFG
    B = 2
    H, W = cfg['H'], cfg['W']

    key = jax.random.PRNGKey(0)
    k_s, k_ids1, k_ids2, k_p = jax.random.split(key, 4)

    sample = 0.5 * jax.random.normal(k_s, (B, cfg['Cin'], H, W), jnp.float32)
    timestep = jnp.array([10.0, 500.0], jnp.float32)
    input_ids = jax.random.randint(k_ids1, (B, 6), 3, cfg['vocab'], dtype=jnp.int32)
    input_ids_2 = jax.random.randint(k_ids2, (B, 6), 3, cfg['vocab'], dtype=jnp.int32)
    add_time_ids = jnp.array([[H, W, 0.0, 0.0, H, W]] * B, jnp.float32)

    params = init_params(k_p, cfg)
    inputs = (sample, timestep, input_ids, input_ids_2, add_time_ids)

    outputs = initial_layer_forward(inputs, params, cfg)
    sample_out = jax.block_until_ready(outputs[0])
    emb_out, ehs_out = outputs[2], outputs[3]

    with jax.default_matmul_precision("highest"):
        ref = reference_forward(inputs, params, cfg)
    jax.block_until_ready(ref[0])

    assert sample_out.shape == (B, cfg['Cout'], H, W)
    assert ehs_out.shape == (B, 8, cfg['enc1']['width'] + cfg['enc2']['width'])
    for got, want, name in ((sample_out, ref[0], 'sample'),
                            (emb_out, ref[2], 'emb'),
                            (ehs_out, ref[3], 'encoder_hidden_states')):
        err = float(jnp.max(jnp.abs(got - want)))
        assert jnp.allclose(got, want, atol=1e-2, rtol=1e-2), f"{name} max abs diff {err}"

    print("KERNEL_OK")
</pallas_src>

<mosaic_0001>
module attributes {stable_mosaic.version = 11 : i64} {
  func.func @kernel(%arg0: i32, %arg1: memref<1x8x32xf32, #tpu.memory_space<vmem>>, %arg2: memref<1x32xf32, #tpu.memory_space<vmem>>, %arg3: memref<1x32xf32, #tpu.memory_space<vmem>>, %arg4: memref<2x32x16xf32, #tpu.memory_space<vmem>>, %arg5: memref<2x1x16xf32, #tpu.memory_space<vmem>>, %arg6: memref<2x32x16xf32, #tpu.memory_space<vmem>>, %arg7: memref<2x1x16xf32, #tpu.memory_space<vmem>>, %arg8: memref<2x32x16xf32, #tpu.memory_space<vmem>>, %arg9: memref<2x1x16xf32, #tpu.memory_space<vmem>>, %arg10: memref<2x16x32xf32, #tpu.memory_space<vmem>>, %arg11: memref<1x32xf32, #tpu.memory_space<vmem>>, %arg12: memref<1x32xf32, #tpu.memory_space<vmem>>, %arg13: memref<1x32xf32, #tpu.memory_space<vmem>>, %arg14: memref<32x128xf32, #tpu.memory_space<vmem>>, %arg15: memref<1x128xf32, #tpu.memory_space<vmem>>, %arg16: memref<128x32xf32, #tpu.memory_space<vmem>>, %arg17: memref<1x32xf32, #tpu.memory_space<vmem>>, %arg18: memref<1x8x32xf32, #tpu.memory_space<vmem>>) attributes {dimension_semantics = [#tpu.dimension_semantics<parallel>], iteration_bounds = array<i64: 2>, scalar_prefetch = 0 : i64, scratch_operands = 0 : i64, tpu.core_type = #tpu.core_type<tc>, window_params = [{transform_indices = @transform_0, window_bounds = array<i64: 1, 8, 32>}, {pipeline_mode = #tpu.pipeline_mode<synchronous>, transform_indices = @transform_1, window_bounds = array<i64: 1, 32>}, {pipeline_mode = #tpu.pipeline_mode<synchronous>, transform_indices = @transform_2, window_bounds = array<i64: 1, 32>}, {pipeline_mode = #tpu.pipeline_mode<synchronous>, transform_indices = @transform_3, window_bounds = array<i64: 2, 32, 16>}, {pipeline_mode = #tpu.pipeline_mode<synchronous>, transform_indices = @transform_4, window_bounds = array<i64: 2, 1, 16>}, {pipeline_mode = #tpu.pipeline_mode<synchronous>, transform_indices = @transform_5, window_bounds = array<i64: 2, 32, 16>}, {pipeline_mode = #tpu.pipeline_mode<synchronous>, transform_indices = @transform_6, window_bounds = array<i64: 2, 1, 16>}, {pipeline_mode = #tpu.pipeline_mode<synchronous>, transform_indices = @transform_7, window_bounds = array<i64: 2, 32, 16>}, {pipeline_mode = #tpu.pipeline_mode<synchronous>, transform_indices = @transform_8, window_bounds = array<i64: 2, 1, 16>}, {pipeline_mode = #tpu.pipeline_mode<synchronous>, transform_indices = @transform_9, window_bounds = array<i64: 2, 16, 32>}, {pipeline_mode = #tpu.pipeline_mode<synchronous>, transform_indices = @transform_10, window_bounds = array<i64: 1, 32>}, {pipeline_mode = #tpu.pipeline_mode<synchronous>, transform_indices = @transform_11, window_bounds = array<i64: 1, 32>}, {pipeline_mode = #tpu.pipeline_mode<synchronous>, transform_indices = @transform_12, window_bounds = array<i64: 1, 32>}, {pipeline_mode = #tpu.pipeline_mode<synchronous>, transform_indices = @transform_13, window_bounds = array<i64: 32, 128>}, {pipeline_mode = #tpu.pipeline_mode<synchronous>, transform_indices = @transform_14, window_bounds = array<i64: 1, 128>}, {pipeline_mode = #tpu.pipeline_mode<synchronous>, transform_indices = @transform_15, window_bounds = array<i64: 128, 32>}, {pipeline_mode = #tpu.pipeline_mode<synchronous>, transform_indices = @transform_16, window_bounds = array<i64: 1, 32>}, {transform_indices = @transform_17, window_bounds = array<i64: 1, 8, 32>}]} {
    %c0 = arith.constant 0 : index
    %c0_0 = arith.constant 0 : index
    %c0_1 = arith.constant 0 : index
    %0 = vector.load %arg1[%c0, %c0_0, %c0_1] : memref<1x8x32xf32, #tpu.memory_space<vmem>>, vector<1x8x32xf32>
    %1 = vector.shape_cast %0 : vector<1x8x32xf32> to vector<8x32xf32>
    %c0_2 = arith.constant 0 : index
    %c0_3 = arith.constant 0 : index
    %2 = vector.load %arg2[%c0_2, %c0_3] : memref<1x32xf32, #tpu.memory_space<vmem>>, vector<1x32xf32>
    %c0_4 = arith.constant 0 : index
    %c0_5 = arith.constant 0 : index
    %3 = vector.load %arg3[%c0_4, %c0_5] : memref<1x32xf32, #tpu.memory_space<vmem>>, vector<1x32xf32>
    %cst = arith.constant dense<0.000000e+00> : vector<8xf32>
    %4 = vector.multi_reduction <add>, %1, %cst [1] : vector<8x32xf32> to vector<8xf32>
    %5 = vector.shape_cast %4 : vector<8xf32> to vector<8x1xf32>
    %cst_6 = arith.constant 3.200000e+01 : f32
    %6 = vector.broadcast %cst_6 : f32 to vector<8x1xf32>
    %7 = arith.divf %5, %6 : vector<8x1xf32>
    %8 = vector.broadcast %7 : vector<8x1xf32> to vector<8x32xf32>
    %9 = arith.subf %1, %8 : vector<8x32xf32>
    %10 = arith.mulf %9, %9 : vector<8x32xf32>
    %cst_7 = arith.constant dense<0.000000e+00> : vector<8xf32>
    %11 = vector.multi_reduction <add>, %10, %cst_7 [1] : vector<8x32xf32> to vector<8xf32>
    %12 = vector.shape_cast %11 : vector<8xf32> to vector<8x1xf32>
    %cst_8 = arith.constant 3.200000e+01 : f32
    %13 = vector.broadcast %cst_8 : f32 to vector<8x1xf32>
    %14 = arith.divf %12, %13 : vector<8x1xf32>
    %cst_9 = arith.constant 9.99999974E-6 : f32
    %15 = vector.broadcast %cst_9 : f32 to vector<8x1xf32>
    %16 = arith.addf %14, %15 : vector<8x1xf32>
    %17 = math.rsqrt %16 : vector<8x1xf32>
    %18 = vector.broadcast %17 : vector<8x1xf32> to vector<8x32xf32>
    %19 = arith.mulf %9, %18 : vector<8x32xf32>
    %20 = vector.broadcast %2 : vector<1x32xf32> to vector<8x32xf32>
    %21 = arith.mulf %19, %20 : vector<8x32xf32>
    %22 = vector.broadcast %3 : vector<1x32xf32> to vector<8x32xf32>
    %23 = arith.addf %21, %22 : vector<8x32xf32>
    %24 = tpu.iota {dimensions = array<i32: 0>} : vector<8x8xi32>
    %25 = tpu.iota {dimensions = array<i32: 1>} : vector<8x8xi32>
    %26 = arith.cmpi sle, %25, %24 : vector<8x8xi32>
    %cst_10 = arith.constant 0.000000e+00 : f32
    %cst_11 = arith.constant -1.000000e+09 : f32
    %27 = vector.broadcast %cst_10 : f32 to vector<8x8xf32>
    %28 = vector.broadcast %cst_11 : f32 to vector<8x8xf32>
    %29 = arith.select %26, %27, %28 : vector<8x8xi1>, vector<8x8xf32>
    %cst_12 = arith.constant 0.000000e+00 : f32
    %30 = vector.broadcast %cst_12 : f32 to vector<8x32xf32>
    %c0_13 = arith.constant 0 : index
    %c0_14 = arith.constant 0 : index
    %c0_15 = arith.constant 0 : index
    %31 = vector.load %arg4[%c0_13, %c0_14, %c0_15] : memref<2x32x16xf32, #tpu.memory_space<vmem>>, vector<1x32x16xf32>
    %32 = vector.shape_cast %31 : vector<1x32x16xf32> to vector<32x16xf32>
    %cst_16 = arith.constant dense<0.000000e+00> : vector<8x16xf32>
    %33 = tpu.matmul %23, %32, %cst_16 {dimension_numbers = #tpu.dot_dimension_numbers<[1], [0], [0], [1], [0, 0, 1, 1], [], []>} : vector<8x32xf32>, vector<32x16xf32>, vector<8x16xf32> -> vector<8x16xf32>
    %c0_17 = arith.constant 0 : index
    %c0_18 = arith.constant 0 : index
    %c0_19 = arith.constant 0 : index
    %34 = vector.load %arg5[%c0_17, %c0_18, %c0_19] : memref<2x1x16xf32, #tpu.memory_space<vmem>>, vector<1x1x16xf32>
    %35 = vector.shape_cast %34 : vector<1x1x16xf32> to vector<1x16xf32>
    %36 = vector.broadcast %35 : vector<1x16xf32> to vector<8x16xf32>
    %37 = arith.addf %33, %36 : vector<8x16xf32>
    %c0_20 = arith.constant 0 : index
    %c0_21 = arith.constant 0 : index
    %c0_22 = arith.constant 0 : index
    %38 = vector.load %arg6[%c0_20, %c0_21, %c0_22] : memref<2x32x16xf32, #tpu.memory_space<vmem>>, vector<1x32x16xf32>
    %39 = vector.shape_cast %38 : vector<1x32x16xf32> to vector<32x16xf32>
    %cst_23 = arith.constant dense<0.000000e+00> : vector<8x16xf32>
    %40 = tpu.matmul %23, %39, %cst_23 {dimension_numbers = #tpu.dot_dimension_numbers<[1], [0], [0], [1], [0, 0, 1, 1], [], []>} : vector<8x32xf32>, vector<32x16xf32>, vector<8x16xf32> -> vector<8x16xf32>
    %c0_24 = arith.constant 0 : index
    %c0_25 = arith.constant 0 : index
    %c0_26 = arith.constant 0 : index
    %41 = vector.load %arg7[%c0_24, %c0_25, %c0_26] : memref<2x1x16xf32, #tpu.memory_space<vmem>>, vector<1x1x16xf32>
    %42 = vector.shape_cast %41 : vector<1x1x16xf32> to vector<1x16xf32>
    %43 = vector.broadcast %42 : vector<1x16xf32> to vector<8x16xf32>
    %44 = arith.addf %40, %43 : vector<8x16xf32>
    %c0_27 = arith.constant 0 : index
    %c0_28 = arith.constant 0 : index
    %c0_29 = arith.constant 0 : index
    %45 = vector.load %arg8[%c0_27, %c0_28, %c0_29] : memref<2x32x16xf32, #tpu.memory_space<vmem>>, vector<1x32x16xf32>
    %46 = vector.shape_cast %45 : vector<1x32x16xf32> to vector<32x16xf32>
    %cst_30 = arith.constant dense<0.000000e+00> : vector<8x16xf32>
    %47 = tpu.matmul %23, %46, %cst_30 {dimension_numbers = #tpu.dot_dimension_numbers<[1], [0], [0], [1], [0, 0, 1, 1], [], []>} : vector<8x32xf32>, vector<32x16xf32>, vector<8x16xf32> -> vector<8x16xf32>
    %c0_31 = arith.constant 0 : index
    %c0_32 = arith.constant 0 : index
    %c0_33 = arith.constant 0 : index
    %48 = vector.load %arg9[%c0_31, %c0_32, %c0_33] : memref<2x1x16xf32, #tpu.memory_space<vmem>>, vector<1x1x16xf32>
    %49 = vector.shape_cast %48 : vector<1x1x16xf32> to vector<1x16xf32>
    %50 = vector.broadcast %49 : vector<1x16xf32> to vector<8x16xf32>
    %51 = arith.addf %47, %50 : vector<8x16xf32>
    %cst_34 = arith.constant dense<0.000000e+00> : vector<8x8xf32>
    %52 = tpu.matmul %37, %44, %cst_34 {dimension_numbers = #tpu.dot_dimension_numbers<[1], [1], [0], [0], [0, 0, 1, 0], [], []>} : vector<8x16xf32>, vector<8x16xf32>, vector<8x8xf32> -> vector<8x8xf32>
    %cst_35 = arith.constant 2.500000e-01 : f32
    %53 = vector.broadcast %cst_35 : f32 to vector<8x8xf32>
    %54 = arith.mulf %52, %53 : vector<8x8xf32>
    %55 = arith.addf %54, %29 : vector<8x8xf32>
    %cst_36 = arith.constant dense<0xFF800000> : vector<8xf32>
    %56 = vector.multi_reduction <maximumf>, %55, %cst_36 [1] : vector<8x8xf32> to vector<8xf32>
    %57 = vector.shape_cast %56 : vector<8xf32> to vector<8x1xf32>
    %58 = vector.broadcast %57 : vector<8x1xf32> to vector<8x8xf32>
    %59 = arith.subf %55, %58 : vector<8x8xf32>
    %60 = math.exp %59 : vector<8x8xf32>
    %cst_37 = arith.constant dense<0.000000e+00> : vector<8xf32>
    %61 = vector.multi_reduction <add>, %60, %cst_37 [1] : vector<8x8xf32> to vector<8xf32>
    %62 = vector.shape_cast %61 : vector<8xf32> to vector<8x1xf32>
    %63 = tpu.reciprocal %62 {approx = true} : vector<8x1xf32> -> vector<8x1xf32>
    %64 = vector.broadcast %63 : vector<8x1xf32> to vector<8x8xf32>
    %65 = arith.mulf %60, %64 : vector<8x8xf32>
    %cst_38 = arith.constant dense<0.000000e+00> : vector<8x16xf32>
    %66 = tpu.matmul %65, %51, %cst_38 {dimension_numbers = #tpu.dot_dimension_numbers<[1], [0], [0], [1], [0, 0, 1, 1], [], []>} : vector<8x8xf32>, vector<8x16xf32>, vector<8x16xf32> -> vector<8x16xf32>
    %c0_39 = arith.constant 0 : index
    %c0_40 = arith.constant 0 : index
    %c0_41 = arith.constant 0 : index
    %67 = vector.load %arg10[%c0_39, %c0_40, %c0_41] : memref<2x16x32xf32, #tpu.memory_space<vmem>>, vector<1x16x32xf32>
    %68 = vector.shape_cast %67 : vector<1x16x32xf32> to vector<16x32xf32>
    %cst_42 = arith.constant dense<0.000000e+00> : vector<8x32xf32>
    %69 = tpu.matmul %66, %68, %cst_42 {dimension_numbers = #tpu.dot_dimension_numbers<[1], [0], [0], [1], [0, 0, 1, 1], [], []>} : vector<8x16xf32>, vector<16x32xf32>, vector<8x32xf32> -> vector<8x32xf32>
    %70 = arith.addf %30, %69 : vector<8x32xf32>
    %c1 = arith.constant 1 : index
    %c0_43 = arith.constant 0 : index
    %c0_44 = arith.constant 0 : index
    %71 = vector.load %arg4[%c1, %c0_43, %c0_44] : memref<2x32x16xf32, #tpu.memory_space<vmem>>, vector<1x32x16xf32>
    %72 = vector.shape_cast %71 : vector<1x32x16xf32> to vector<32x16xf32>
    %cst_45 = arith.constant dense<0.000000e+00> : vector<8x16xf32>
    %73 = tpu.matmul %23, %72, %cst_45 {dimension_numbers = #tpu.dot_dimension_numbers<[1], [0], [0], [1], [0, 0, 1, 1], [], []>} : vector<8x32xf32>, vector<32x16xf32>, vector<8x16xf32> -> vector<8x16xf32>
    %c1_46 = arith.constant 1 : index
    %c0_47 = arith.constant 0 : index
    %c0_48 = arith.constant 0 : index
    %74 = vector.load %arg5[%c1_46, %c0_47, %c0_48] : memref<2x1x16xf32, #tpu.memory_space<vmem>>, vector<1x1x16xf32>
    %75 = vector.shape_cast %74 : vector<1x1x16xf32> to vector<1x16xf32>
    %76 = vector.broadcast %75 : vector<1x16xf32> to vector<8x16xf32>
    %77 = arith.addf %73, %76 : vector<8x16xf32>
    %c1_49 = arith.constant 1 : index
    %c0_50 = arith.constant 0 : index
    %c0_51 = arith.constant 0 : index
    %78 = vector.load %arg6[%c1_49, %c0_50, %c0_51] : memref<2x32x16xf32, #tpu.memory_space<vmem>>, vector<1x32x16xf32>
    %79 = vector.shape_cast %78 : vector<1x32x16xf32> to vector<32x16xf32>
    %cst_52 = arith.constant dense<0.000000e+00> : vector<8x16xf32>
    %80 = tpu.matmul %23, %79, %cst_52 {dimension_numbers = #tpu.dot_dimension_numbers<[1], [0], [0], [1], [0, 0, 1, 1], [], []>} : vector<8x32xf32>, vector<32x16xf32>, vector<8x16xf32> -> vector<8x16xf32>
    %c1_53 = arith.constant 1 : index
    %c0_54 = arith.constant 0 : index
    %c0_55 = arith.constant 0 : index
    %81 = vector.load %arg7[%c1_53, %c0_54, %c0_55] : memref<2x1x16xf32, #tpu.memory_space<vmem>>, vector<1x1x16xf32>
    %82 = vector.shape_cast %81 : vector<1x1x16xf32> to vector<1x16xf32>
    %83 = vector.broadcast %82 : vector<1x16xf32> to vector<8x16xf32>
    %84 = arith.addf %80, %83 : vector<8x16xf32>
    %c1_56 = arith.constant 1 : index
    %c0_57 = arith.constant 0 : index
    %c0_58 = arith.constant 0 : index
    %85 = vector.load %arg8[%c1_56, %c0_57, %c0_58] : memref<2x32x16xf32, #tpu.memory_space<vmem>>, vector<1x32x16xf32>
    %86 = vector.shape_cast %85 : vector<1x32x16xf32> to vector<32x16xf32>
    %cst_59 = arith.constant dense<0.000000e+00> : vector<8x16xf32>
    %87 = tpu.matmul %23, %86, %cst_59 {dimension_numbers = #tpu.dot_dimension_numbers<[1], [0], [0], [1], [0, 0, 1, 1], [], []>} : vector<8x32xf32>, vector<32x16xf32>, vector<8x16xf32> -> vector<8x16xf32>
    %c1_60 = arith.constant 1 : index
    %c0_61 = arith.constant 0 : index
    %c0_62 = arith.constant 0 : index
    %88 = vector.load %arg9[%c1_60, %c0_61, %c0_62] : memref<2x1x16xf32, #tpu.memory_space<vmem>>, vector<1x1x16xf32>
    %89 = vector.shape_cast %88 : vector<1x1x16xf32> to vector<1x16xf32>
    %90 = vector.broadcast %89 : vector<1x16xf32> to vector<8x16xf32>
    %91 = arith.addf %87, %90 : vector<8x16xf32>
    %cst_63 = arith.constant dense<0.000000e+00> : vector<8x8xf32>
    %92 = tpu.matmul %77, %84, %cst_63 {dimension_numbers = #tpu.dot_dimension_numbers<[1], [1], [0], [0], [0, 0, 1, 0], [], []>} : vector<8x16xf32>, vector<8x16xf32>, vector<8x8xf32> -> vector<8x8xf32>
    %cst_64 = arith.constant 2.500000e-01 : f32
    %93 = vector.broadcast %cst_64 : f32 to vector<8x8xf32>
    %94 = arith.mulf %92, %93 : vector<8x8xf32>
    %95 = arith.addf %94, %29 : vector<8x8xf32>
    %cst_65 = arith.constant dense<0xFF800000> : vector<8xf32>
    %96 = vector.multi_reduction <maximumf>, %95, %cst_65 [1] : vector<8x8xf32> to vector<8xf32>
    %97 = vector.shape_cast %96 : vector<8xf32> to vector<8x1xf32>
    %98 = vector.broadcast %97 : vector<8x1xf32> to vector<8x8xf32>
    %99 = arith.subf %95, %98 : vector<8x8xf32>
    %100 = math.exp %99 : vector<8x8xf32>
    %cst_66 = arith.constant dense<0.000000e+00> : vector<8xf32>
    %101 = vector.multi_reduction <add>, %100, %cst_66 [1] : vector<8x8xf32> to vector<8xf32>
    %102 = vector.shape_cast %101 : vector<8xf32> to vector<8x1xf32>
    %103 = tpu.reciprocal %102 {approx = true} : vector<8x1xf32> -> vector<8x1xf32>
    %104 = vector.broadcast %103 : vector<8x1xf32> to vector<8x8xf32>
    %105 = arith.mulf %100, %104 : vector<8x8xf32>
    %cst_67 = arith.constant dense<0.000000e+00> : vector<8x16xf32>
    %106 = tpu.matmul %105, %91, %cst_67 {dimension_numbers = #tpu.dot_dimension_numbers<[1], [0], [0], [1], [0, 0, 1, 1], [], []>} : vector<8x8xf32>, vector<8x16xf32>, vector<8x16xf32> -> vector<8x16xf32>
    %c1_68 = arith.constant 1 : index
    %c0_69 = arith.constant 0 : index
    %c0_70 = arith.constant 0 : index
    %107 = vector.load %arg10[%c1_68, %c0_69, %c0_70] : memref<2x16x32xf32, #tpu.memory_space<vmem>>, vector<1x16x32xf32>
    %108 = vector.shape_cast %107 : vector<1x16x32xf32> to vector<16x32xf32>
    %cst_71 = arith.constant dense<0.000000e+00> : vector<8x32xf32>
    %109 = tpu.matmul %106, %108, %cst_71 {dimension_numbers = #tpu.dot_dimension_numbers<[1], [0], [0], [1], [0, 0, 1, 1], [], []>} : vector<8x16xf32>, vector<16x32xf32>, vector<8x32xf32> -> vector<8x32xf32>
    %110 = arith.addf %70, %109 : vector<8x32xf32>
    %111 = arith.addf %1, %110 : vector<8x32xf32>
    %c0_72 = arith.constant 0 : index
    %c0_73 = arith.constant 0 : index
    %112 = vector.load %arg11[%c0_72, %c0_73] : memref<1x32xf32, #tpu.memory_space<vmem>>, vector<1x32xf32>
    %113 = vector.broadcast %112 : vector<1x32xf32> to vector<8x32xf32>
    %114 = arith.addf %111, %113 : vector<8x32xf32>
    %c0_74 = arith.constant 0 : index
    %c0_75 = arith.constant 0 : index
    %115 = vector.load %arg12[%c0_74, %c0_75] : memref<1x32xf32, #tpu.memory_space<vmem>>, vector<1x32xf32>
    %c0_76 = arith.constant 0 : index
    %c0_77 = arith.constant 0 : index
    %116 = vector.load %arg13[%c0_76, %c0_77] : memref<1x32xf32, #tpu.memory_space<vmem>>, vector<1x32xf32>
    %cst_78 = arith.constant dense<0.000000e+00> : vector<8xf32>
    %117 = vector.multi_reduction <add>, %114, %cst_78 [1] : vector<8x32xf32> to vector<8xf32>
    %118 = vector.shape_cast %117 : vector<8xf32> to vector<8x1xf32>
    %cst_79 = arith.constant 3.200000e+01 : f32
    %119 = vector.broadcast %cst_79 : f32 to vector<8x1xf32>
    %120 = arith.divf %118, %119 : vector<8x1xf32>
    %121 = vector.broadcast %120 : vector<8x1xf32> to vector<8x32xf32>
    %122 = arith.subf %114, %121 : vector<8x32xf32>
    %123 = arith.mulf %122, %122 : vector<8x32xf32>
    %cst_80 = arith.constant dense<0.000000e+00> : vector<8xf32>
    %124 = vector.multi_reduction <add>, %123, %cst_80 [1] : vector<8x32xf32> to vector<8xf32>
    %125 = vector.shape_cast %124 : vector<8xf32> to vector<8x1xf32>
    %cst_81 = arith.constant 3.200000e+01 : f32
    %126 = vector.broadcast %cst_81 : f32 to vector<8x1xf32>
    %127 = arith.divf %125, %126 : vector<8x1xf32>
    %cst_82 = arith.constant 9.99999974E-6 : f32
    %128 = vector.broadcast %cst_82 : f32 to vector<8x1xf32>
    %129 = arith.addf %127, %128 : vector<8x1xf32>
    %130 = math.rsqrt %129 : vector<8x1xf32>
    %131 = vector.broadcast %130 : vector<8x1xf32> to vector<8x32xf32>
    %132 = arith.mulf %122, %131 : vector<8x32xf32>
    %133 = vector.broadcast %115 : vector<1x32xf32> to vector<8x32xf32>
    %134 = arith.mulf %132, %133 : vector<8x32xf32>
    %135 = vector.broadcast %116 : vector<1x32xf32> to vector<8x32xf32>
    %136 = arith.addf %134, %135 : vector<8x32xf32>
    %c0_83 = arith.constant 0 : index
    %c0_84 = arith.constant 0 : index
    %137 = vector.load %arg14[%c0_83, %c0_84] : memref<32x128xf32, #tpu.memory_space<vmem>>, vector<32x128xf32>
    %cst_85 = arith.constant dense<0.000000e+00> : vector<8x128xf32>
    %138 = tpu.matmul %136, %137, %cst_85 {dimension_numbers = #tpu.dot_dimension_numbers<[1], [0], [0], [1], [0, 0, 1, 1], [], []>} : vector<8x32xf32>, vector<32x128xf32>, vector<8x128xf32> -> vector<8x128xf32>
    %c0_86 = arith.constant 0 : index
    %c0_87 = arith.constant 0 : index
    %139 = vector.load %arg15[%c0_86, %c0_87] : memref<1x128xf32, #tpu.memory_space<vmem>>, vector<1x128xf32>
    %140 = vector.broadcast %139 : vector<1x128xf32> to vector<8x128xf32>
    %141 = arith.addf %138, %140 : vector<8x128xf32>
    %cst_88 = arith.constant 1.702000e+00 : f32
    %142 = vector.broadcast %cst_88 : f32 to vector<8x128xf32>
    %143 = arith.mulf %142, %141 : vector<8x128xf32>
    %144 = arith.negf %143 : vector<8x128xf32>
    %145 = math.exp %144 : vector<8x128xf32>
    %cst_89 = arith.constant 1.000000e+00 : f32
    %146 = vector.broadcast %cst_89 : f32 to vector<8x128xf32>
    %147 = arith.addf %146, %145 : vector<8x128xf32>
    %148 = arith.divf %146, %147 : vector<8x128xf32>
    %149 = arith.mulf %141, %148 : vector<8x128xf32>
    %c0_90 = arith.constant 0 : index
    %c0_91 = arith.constant 0 : index
    %150 = vector.load %arg16[%c0_90, %c0_91] : memref<128x32xf32, #tpu.memory_space<vmem>>, vector<128x32xf32>
    %cst_92 = arith.constant dense<0.000000e+00> : vector<8x32xf32>
    %151 = tpu.matmul %149, %150, %cst_92 {dimension_numbers = #tpu.dot_dimension_numbers<[1], [0], [0], [1], [0, 0, 1, 1], [], []>} : vector<8x128xf32>, vector<128x32xf32>, vector<8x32xf32> -> vector<8x32xf32>
    %152 = arith.addf %114, %151 : vector<8x32xf32>
    %c0_93 = arith.constant 0 : index
    %c0_94 = arith.constant 0 : index
    %153 = vector.load %arg17[%c0_93, %c0_94] : memref<1x32xf32, #tpu.memory_space<vmem>>, vector<1x32xf32>
    %154 = vector.broadcast %153 : vector<1x32xf32> to vector<8x32xf32>
    %155 = arith.addf %152, %154 : vector<8x32xf32>
    %c0_95 = arith.constant 0 : index
    %c0_96 = arith.constant 0 : index
    %c0_97 = arith.constant 0 : index
    %156 = vector.load %arg18[%c0_95, %c0_96, %c0_97] : memref<1x8x32xf32, #tpu.memory_space<vmem>>, vector<1x8x32xf32>
    %157 = vector.shape_cast %156 : vector<1x8x32xf32> to vector<8x32xf32>
    %158 = vector.shape_cast %155 : vector<8x32xf32> to vector<1x8x32xf32>
    tpu.vector_store %arg18[%c0_95, %c0_96, %c0_97], %158 {strides = array<i32>} : memref<1x8x32xf32, #tpu.memory_space<vmem>>, vector<1x8x32xf32>,
    return
  }
  func.func @transform_0(%arg0: i32) -> (i32, i32, i32) {
    %c0_i32 = arith.constant 0 : i32
    %c0_i32_0 = arith.constant 0 : i32
    %c0_i32_1 = arith.constant 0 : i32
    return %arg0, %c0_i32, %c0_i32_0 : i32, i32, i32
  }
  func.func @transform_1(%arg0: i32) -> (i32, i32) {
    %c0_i32 = arith.constant 0 : i32
    %c0_i32_0 = arith.constant 0 : i32
    %c0_i32_1 = arith.constant 0 : i32
    return %c0_i32, %c0_i32_0 : i32, i32
  }
  func.func @transform_2(%arg0: i32) -> (i32, i32) {
    %c0_i32 = arith.constant 0 : i32
    %c0_i32_0 = arith.constant 0 : i32
    %c0_i32_1 = arith.constant 0 : i32
    return %c0_i32, %c0_i32_0 : i32, i32
  }
  func.func @transform_3(%arg0: i32) -> (i32, i32, i32) {
    %c0_i32 = arith.constant 0 : i32
    %c0_i32_0 = arith.constant 0 : i32
    %c0_i32_1 = arith.constant 0 : i32
    %c0_i32_2 = arith.constant 0 : i32
    return %c0_i32, %c0_i32_0, %c0_i32_1 : i32, i32, i32
  }
  func.func @transform_4(%arg0: i32) -> (i32, i32, i32) {
    %c0_i32 = arith.constant 0 : i32
    %c0_i32_0 = arith.constant 0 : i32
    %c0_i32_1 = arith.constant 0 : i32
    %c0_i32_2 = arith.constant 0 : i32
    return %c0_i32, %c0_i32_0, %c0_i32_1 : i32, i32, i32
  }
  func.func @transform_5(%arg0: i32) -> (i32, i32, i32) {
    %c0_i32 = arith.constant 0 : i32
    %c0_i32_0 = arith.constant 0 : i32
    %c0_i32_1 = arith.constant 0 : i32
    %c0_i32_2 = arith.constant 0 : i32
    return %c0_i32, %c0_i32_0, %c0_i32_1 : i32, i32, i32
  }
  func.func @transform_6(%arg0: i32) -> (i32, i32, i32) {
    %c0_i32 = arith.constant 0 : i32
    %c0_i32_0 = arith.constant 0 : i32
    %c0_i32_1 = arith.constant 0 : i32
    %c0_i32_2 = arith.constant 0 : i32
    return %c0_i32, %c0_i32_0, %c0_i32_1 : i32, i32, i32
  }
  func.func @transform_7(%arg0: i32) -> (i32, i32, i32) {
    %c0_i32 = arith.constant 0 : i32
    %c0_i32_0 = arith.constant 0 : i32
    %c0_i32_1 = arith.constant 0 : i32
    %c0_i32_2 = arith.constant 0 : i32
    return %c0_i32, %c0_i32_0, %c0_i32_1 : i32, i32, i32
  }
  func.func @transform_8(%arg0: i32) -> (i32, i32, i32) {
    %c0_i32 = arith.constant 0 : i32
    %c0_i32_0 = arith.constant 0 : i32
    %c0_i32_1 = arith.constant 0 : i32
    %c0_i32_2 = arith.constant 0 : i32
    return %c0_i32, %c0_i32_0, %c0_i32_1 : i32, i32, i32
  }
  func.func @transform_9(%arg0: i32) -> (i32, i32, i32) {
    %c0_i32 = arith.constant 0 : i32
    %c0_i32_0 = arith.constant 0 : i32
    %c0_i32_1 = arith.constant 0 : i32
    %c0_i32_2 = arith.constant 0 : i32
    return %c0_i32, %c0_i32_0, %c0_i32_1 : i32, i32, i32
  }
  func.func @transform_10(%arg0: i32) -> (i32, i32) {
    %c0_i32 = arith.constant 0 : i32
    %c0_i32_0 = arith.constant 0 : i32
    %c0_i32_1 = arith.constant 0 : i32
    return %c0_i32, %c0_i32_0 : i32, i32
  }
  func.func @transform_11(%arg0: i32) -> (i32, i32) {
    %c0_i32 = arith.constant 0 : i32
    %c0_i32_0 = arith.constant 0 : i32
    %c0_i32_1 = arith.constant 0 : i32
    return %c0_i32, %c0_i32_0 : i32, i32
  }
  func.func @transform_12(%arg0: i32) -> (i32, i32) {
    %c0_i32 = arith.constant 0 : i32
    %c0_i32_0 = arith.constant 0 : i32
    %c0_i32_1 = arith.constant 0 : i32
    return %c0_i32, %c0_i32_0 : i32, i32
  }
  func.func @transform_13(%arg0: i32) -> (i32, i32) {
    %c0_i32 = arith.constant 0 : i32
    %c0_i32_0 = arith.constant 0 : i32
    %c0_i32_1 = arith.constant 0 : i32
    return %c0_i32, %c0_i32_0 : i32, i32
  }
  func.func @transform_14(%arg0: i32) -> (i32, i32) {
    %c0_i32 = arith.constant 0 : i32
    %c0_i32_0 = arith.constant 0 : i32
    %c0_i32_1 = arith.constant 0 : i32
    return %c0_i32, %c0_i32_0 : i32, i32
  }
  func.func @transform_15(%arg0: i32) -> (i32, i32) {
    %c0_i32 = arith.constant 0 : i32
    %c0_i32_0 = arith.constant 0 : i32
    %c0_i32_1 = arith.constant 0 : i32
    return %c0_i32, %c0_i32_0 : i32, i32
  }
  func.func @transform_16(%arg0: i32) -> (i32, i32) {
    %c0_i32 = arith.constant 0 : i32
    %c0_i32_0 = arith.constant 0 : i32
    %c0_i32_1 = arith.constant 0 : i32
    return %c0_i32, %c0_i32_0 : i32, i32
  }
  func.func @transform_17(%arg0: i32) -> (i32, i32, i32) {
    %c0_i32 = arith.constant 0 : i32
    %c0_i32_0 = arith.constant 0 : i32
    %c0_i32_1 = arith.constant 0 : i32
    return %arg0, %c0_i32, %c0_i32_0 : i32, i32, i32
  }
}

</mosaic_0001>

<bundles_post_ra>
// kernel: tpu_custom_call.1
= control target key start
LH: loop header
LB: loop body
LE: loop exit
PB: predicated region body
PF: predicated region fallthrough
CT: control target
= control target key end

     0   :  { %s2792_s0 = inlined_call_operand.vmem [shape: f32[2,8,32], index: 0, kind: input, shape index: {}]   ;;  %s2793_s1 = inlined_call_operand.vmem [shape: f32[1,32], index: 1, kind: input, shape index: {}]   ;;  %s2794_s2 = inlined_call_operand.vmem [shape: f32[1,32], index: 2, kind: input, shape index: {}]   ;;  %s2795_s3 = inlined_call_operand.vmem [shape: f32[2,32,16], index: 3, kind: input, shape index: {}]   ;;  %s2796_s4 = inlined_call_operand.vmem [shape: f32[2,1,16], index: 4, kind: input, shape index: {}]   ;;  %s2797_s5 = inlined_call_operand.vmem [shape: f32[2,32,16], index: 5, kind: input, shape index: {}]   ;;  %s2798_s6 = inlined_call_operand.vmem [shape: f32[2,1,16], index: 6, kind: input, shape index: {}]   ;;  %s2799_s7 = inlined_call_operand.vmem [shape: f32[2,32,16], index: 7, kind: input, shape index: {}]   ;;  %s2800_s8 = inlined_call_operand.vmem [shape: f32[2,1,16], index: 8, kind: input, shape index: {}]   ;;  %s2801_s9 = inlined_call_operand.vmem [shape: f32[2,16,32], index: 9, kind: input, shape index: {}]   ;;  %s2802_s10 = inlined_call_operand.vmem [shape: f32[1,32], index: 10, kind: input, shape index: {}]   ;;  %s2803_s11 = inlined_call_operand.vmem [shape: f32[1,32], index: 11, kind: input, shape index: {}]   ;;  %s2804_s12 = inlined_call_operand.vmem [shape: f32[1,32], index: 12, kind: input, shape index: {}]   ;;  %s2805_s13 = inlined_call_operand.vmem [shape: f32[32,128], index: 13, kind: input, shape index: {}]   ;;  %s2806_s14 = inlined_call_operand.vmem [shape: f32[1,128], index: 14, kind: input, shape index: {}]   ;;  %s2807_s15 = inlined_call_operand.vmem [shape: f32[128,32], index: 15, kind: input, shape index: {}]   ;;  %s2808_s16 = inlined_call_operand.vmem [shape: f32[1,32], index: 16, kind: input, shape index: {}]   ;;  %s2809_s17 = inlined_call_operand.hbm [shape: f32[2,8,32], index: 17, kind: output, shape index: {}]  }
   0x1   :  { %2814 = sst [smem:[#allocation9_spill]] %s2792_s0 }
   0x2   :  { %2815 = sst [smem:[#allocation10_spill]] %s2793_s1 }
   0x3   :  { %2816 = sst [smem:[#allocation11_spill]] %s2794_s2 }
   0x4   :  { %22 = vsyncpa [#allocation3], 0 }
   0x5   :  { %24 = vsyncpa [#allocation3 + $0x1], 0  ;;  %s2411_s24 = smov 0   ;;  %s2413_s25 = smov 0  }
   0x6   :  { %s2415_s26 = smov 0   ;;  %s2417_s27 = smov 0  }
   0x7 LB: > { %2817 = sst [smem:[#allocation5_spill]] %s2310_s26  ;;  %s2432_s28 = sadd.s32 4294967295, %s2314_s27   ;;  %s2314_s27 = sphi %s2417_s27, %s2827_s27   ;;  %s2310_s26 = sphi %s2415_s26, %s2829_s26   ;;  %s2306_s25 = sphi %s2413_s25, %s2831_s25   ;;  %s2302_s24 = sphi %s2411_s24, %s2830_s24  }
   0x8   : > { %s1853_s29 = sadd.s32 4294967294, %s2314_s27   ;;  %s2436_s0 = sadd.s32 1, %s2314_s27  }
   0x9   : > { %2818 = sst [smem:[#allocation6_spill]] %s2436_s0  ;;  %s399_s30 = sadd.s32 1, %s2310_s26 }
   0xa   : > { %s396_s18 = ssub.s32 %s2314_s27, %s2436_s0  ;;  %p409_p0 = scmp.ne.s32.totalorder %s2310_s26, %s2306_s25 }
   0xb   : > { %p397_p1 = scmp.eq.s32.totalorder %s396_s18, 0  ;;  %p410_p2 = scmp.eq.s32.totalorder %s2432_s28, 1 }
   0xc   : > { %p415_p3 = scmp.ne.s32.totalorder %s2306_s25, %s2302_s24  ;;  %p416_p4 = scmp.eq.s32.totalorder %s1853_s29, 1 }
   0xd   : > { %s2447_s19 = scalar_select %p397_p1, %s2310_s26, %s399_s30  }
   0xe   : > { %p2449_p5 = por %p410_p2, %p409_p0  ;;  %p2453_p6 = por %p416_p4, %p415_p3 }
   0xf   : > { %2819 = sst [smem:[#allocation7_spill]] %s2447_s19  ;;  %p1856_p7 = scmp.ge.s32.totalorder %s2314_s27, 1 }
  0x10   : > { %s2821_s20 = scalar_select %p2453_p6, 1, 0 }
  0x11   : > { %p489_p8 = scmp.lt.s32.totalorder %s2314_s27, 3 }
  0x12   : > { %2822 = sst [smem:[#allocation8_spill]] %s2821_s20 }
  0x13   : > { %p490_p9 = pnand %p1856_p7, %p489_p8 }
  0x14   : > { %p540_p10 = scmp.lt.s32.totalorder (!%p490_p9), %s2432_s28, 1  ;;  %vm547_vm0 = vcmask (!%p490_p9), 261120   ;;  %s2823_s30 = sld [smem:[#allocation9_spill]] (!%p490_p9)  ;;  %v582_v7 = vld [vmem:[%s2795_s3] sm:$0xff] (!%p490_p9)  ;;  %v583_v8 = vld [vmem:[%s2795_s3 + $0x8] sm:$0xff] (!%p490_p9)  ;;  %v2316_v10 = vmov (!%p490_p9), 0.0|0.0   ;;  %v576_v60 = vlaneseq (!%p490_p9) }
  0x15   : > { %493 = sbr.rel (%p490_p9) target bundleno = 3073 (0xc01), region = 88  ;;  %v2122_v9 = vpack.c.bf16 (!%p490_p9), %v583_v8, %v582_v7  ;;  %2121 = vmatprep.subr.bf16.mxu0 (!%p490_p9), %v2316_v10  ;;  %v584_v11 = vld [vmem:[%s2795_s3 + $0x10] sm:$0xff] (!%p490_p9)  ;;  %v585_v12 = vld [vmem:[%s2795_s3 + $0x18] sm:$0xff] (!%p490_p9)  ;;  %vm2317_vm1 = vmmov (!%p490_p9), 0   ;;  %v2318_v14 = vmov (!%p490_p9), 0.0   ;;  %v666_v21 = vld [vmem:[%s2797_s5] sm:$0xff] (!%p490_p9) }
  0x16   : > { %v2125_v13 = vpack.c.bf16 (!%p490_p9), %v585_v12, %v584_v11  ;;  %1983 = vmatprep.mubr.msk.f32.mxu0 (!%p490_p9), %vm2317_vm1, %v2318_v14  ;;  %2013 = vmatprep.subr.mxu1 (!%p490_p9), %v2318_v14  ;;  %v667_v22 = vld [vmem:[%s2797_s5 + $0x8] sm:$0xff] (!%p490_p9)  ;;  %s2825_s2 = sld [smem:[#allocation11_spill]] (!%p490_p9)  ;;  %v668_v27 = vld [vmem:[%s2797_s5 + $0x10] sm:$0xff] (!%p490_p9)  ;;  %v669_v28 = vld [vmem:[%s2797_s5 + $0x18] sm:$0xff] (!%p490_p9)  ;;  %vm828_vm2 = vcmask (!%p490_p9), 130048   ;;  %v577_v61 = vshrl.u32 (!%p490_p9), %v576_v60, 7 }
  0x17   : > { %2123 = vmatpush3.bf16.msra.mxu0 (!%p490_p9), %v2122_v9  ;;  %2015 = vmatprep.mubr.msk.f32.mxu1 (!%p490_p9), %vm2317_vm1, %v2318_v14  ;;  %v2128_v25 = vpack.c.bf16 (!%p490_p9), %v667_v22, %v666_v21  ;;  %v2131_v29 = vpack.c.bf16 (!%p490_p9), %v669_v28, %v668_v27  ;;  %v747_v30 = vld [vmem:[%s2799_s7] sm:$0xff] (!%p490_p9)  ;;  %v748_v31 = vld [vmem:[%s2799_s7 + $0x8] sm:$0xff] (!%p490_p9)  ;;  %v749_v33 = vld [vmem:[%s2799_s7 + $0x10] sm:$0xff] (!%p490_p9)  ;;  %v579_v62 = vand.u32 (!%p490_p9), 127, %v576_v60  ;;  %vm907_vm4 = vcmask (!%p490_p9), 64512   ;;  %s537_s0 = sand.u32 (!%p490_p9), 1, %s2306_s25  }
  0x18   : > { %2124 = vmatprep.subr.bf16.mxu0 (!%p490_p9), %v2316_v10  ;;  %v2134_v32 = vpack.c.bf16 (!%p490_p9), %v748_v31, %v747_v30  ;;  %v750_v34 = vld [vmem:[%s2799_s7 + $0x18] sm:$0xff] (!%p490_p9)  ;;  %v1863_v38 = vld [vmem:[%s2798_s6] ss:$0 sm:$0xff] (!%p490_p9)  ;;  %v1871_v41 = vld [vmem:[%s2795_s3 + $0x28] sm:$0xff] (!%p490_p9)  ;;  %s1857_s23 = sshll.u32 (!%p490_p9), %s537_s0, 3  ;;  %s1906_s29 = sshll.u32 (!%p490_p9), %s2432_s28, 7 }
  0x19   : > { %v2137_v35 = vpack.c.bf16 (!%p490_p9), %v750_v34, %v749_v33  ;;  %v1870_v40 = vld [vmem:[%s2795_s3 + $0x20] sm:$0xff] (!%p490_p9)  ;;  %v1872_v47 = vld [vmem:[%s2795_s3 + $0x30] sm:$0xff] (!%p490_p9)  ;;  %v1873_v48 = vld [vmem:[%s2795_s3 + $0x38] sm:$0xff] (!%p490_p9)  ;;  %vm580_vm3 = vcmp.le.s32.totalorder (!%p490_p9), %v579_v62, %v577_v61  ;;  %s1781_s20 = scalar_lea.sflag (!%p490_p9), [#allocation3], %s537_s0 }
  0x1a   : > { %v1861_v42 = vld [vmem:[%s2796_s4] ss:$0 sm:$0xff] (!%p490_p9)  ;;  %v2140_v45 = vpack.c.bf16 (!%p490_p9), %v1871_v41, %v1870_v40  ;;  %v2143_v50 = vpack.c.bf16 (!%p490_p9), %v1873_v48, %v1872_v47  ;;  %v1885_v53 = vld [vmem:[%s2799_s7 + $0x28] sm:$0xff] (!%p490_p9)  ;;  %v1886_v57 = vld [vmem:[%s2799_s7 + $0x30] sm:$0xff] (!%p490_p9) }
  0x1b   : > { %2126 = vmatpush3.bf16.msra.mxu0 (!%p490_p9), %v2125_v13  ;;  %v1865_v49 = vld [vmem:[%s2800_s8] ss:$0 sm:$0xff] (!%p490_p9)  ;;  %v1887_v58 = vld [vmem:[%s2799_s7 + $0x38] sm:$0xff] (!%p490_p9)  ;;  %v1882_v30 = vld [vmem:[%s2798_s6 + $0x1] ss:$0 sm:$0xff] (!%p490_p9) }
  0x1c   : > { %s541_s21 = scalar_select %p540_p10, %s2432_s28, 1  ;;  %2127 = vmatprep.subr.bf16.mxu0 %v2316_v10  ;;  %v1860_v23 = vld [vmem:[%s2825_s2] ss:$0 sm:$0xff]  ;;  %v2155_v59 = vpack.c.bf16 %v1887_v58, %v1886_v57  ;;  %v1894_v47 = vld [vmem:[%s2801_s9 + $0x10] sm:$0xff]  ;;  %v1895_v48 = vld [vmem:[%s2801_s9 + $0x18] sm:$0xff] }
  0x1d   : > { %v1884_v52 = vld [vmem:[%s2799_s7 + $0x20] sm:$0xff] }
  0x1e   : > { %s1858_s22 = sshll.u32 %s541_s21, 3  ;;  %s2824_s21 = sld [smem:[#allocation10_spill]]  ;;  %v2152_v56 = vpack.c.bf16 %v1885_v53, %v1884_v52  ;;  %v993_v52 = vld [vmem:[%s2801_s9 + $0x8] sm:$0xff] }
  0x1f   : > { %s543_s18 = scalar_lea.vmem %s2823_s30, %s1858_s22  ;;  %s539_s30 = scalar_lea.vmem [#allocation2], %s1857_s23 }
  0x20   : > { %v2464_v0 = vld [vmem:[%s543_s18] sm:$0xff]  ;;  %s1794_s18 = sshll.u32 %s539_s30, 4  ;;  %s2320_s23 = smov [#allocation2]   ;;  %s2751_s18 = int_to_ptr.vmem [resolvable:$true] %s1794_s18 }
  0x21   : > { %v548_v1 = vsel %vm547_vm0, %v2464_v0, 0.0  ;;  %s2252_s28 = scalar_lea.vmem %s2751_s18, 128  ;;  %s2256_s22 = sshll.u32 %s2320_s23, 4  ;;  %s2257_s22 = int_to_ptr.vmem [resolvable:$false] %s2256_s22 }
  0x22   : > { %549 = vadd.xlane.f32.xlu0 %v548_v1  ;;  %v2319_v1 = vmov -1e+09   ;;  %p2253_p11 = scmp.ne.s32.totalorder %s2751_s18, %s2252_s28  ;;  %s2258_s2 = scalar_lea.vmem %s2257_s22, 256 }
  0x23   : > { %p2259_p0 = scmp.lt.s32.totalorder %s2751_s18, %s2257_s22  ;;  %p2260_p1 = scmp.lt.s32.totalorder %s2258_s2, %s2252_s28 }
  0x24   : > { %v1859_v19 = vld [vmem:[%s2824_s21] ss:$0 sm:$0xff]  ;;  %s2749_s21 = scalar_lea.hbm %s2809_s17, %s1906_s29  ;;  %p2254_p12 = pnand %p2253_p11, %p2449_p5 }
  0x25   : > { %p2261_p2 = por %p2260_p1, %p2259_p0 }
  0x26   : > { %p2255_p13 = pneg %p2254_p12 }
  0x28   : > { %p2262_p3 = pnand %p2261_p2, %p2255_p13 }
  0xaf   : > { %v550_v2 = vpop.xlane.xlu0 %549 }
  0xb0   : > { %v552_v3 = vmul.f32 0.03125, %v550_v2  ;;  %v581_v2 = vsel %vm580_vm3, 0.0, %v2319_v1 }
  0xb2   : > { %v553_v4 = vsub.f32 %v2464_v0, %v552_v3 }
  0xb4   : > { %v554_v5 = vmul.f32 %v553_v4, %v553_v4 }
  0xb6   : > { %v555_v6 = vsel %vm547_vm0, %v554_v5, 0.0 }
  0xb7   : > { %556 = vadd.xlane.f32.xlu0 %v555_v6 }
 0x144   : > { %v557_v15 = vpop.xlane.xlu0 %556 }
 0x145   : > { %v558_v16 = vmul.f32 0.03125, %v557_v15 }
 0x147   : > { %v559_v17 = vadd.f32 1e-05, %v558_v16 }
 0x149   : > { %2236 = vrsqrt.f32 %v559_v17 }
 0x153   : > { %v2237_v18 = vpop.eup %2236 }
 0x154   : > { %v561_v20 = vmul.f32 %v2237_v18, %v553_v4 }
 0x156   : > { %v568_v24 = vmul.f32 %v1859_v19, %v561_v20  ;;  %v1877_v19 = vld [vmem:[%s2797_s5 + $0x20] sm:$0xff]  ;;  %v1878_v20 = vld [vmem:[%s2797_s5 + $0x28] sm:$0xff] }
 0x157   : > { %v2146_v22 = vpack.c.bf16 %v1878_v20, %v1877_v19  ;;  %v1899_v19 = vld [vmem:[%s2803_s11] ss:$0 sm:$0xff] }
 0x158   : > { %v2502_v26 = vadd.f32 %v1860_v23, %v568_v24  ;;  %v1879_v24 = vld [vmem:[%s2797_s5 + $0x30] sm:$0xff] }
 0x15a   : > { %1984 = vmatmul.mubr.msk.f32.vlgmr.msra.gmra.mrb[0].mxu0 %vm547_vm0, %v2502_v26 }
 0x15b   : > { %2129 = vmatpush3.bf16.msra.mxu0 %v2128_v25  ;;  %1994 = vmatprep.mubr.msk.f32.mxu0 %vm2317_vm1, %v2318_v14  ;;  %v1880_v25 = vld [vmem:[%s2797_s5 + $0x38] sm:$0xff] }
 0x15c   : > { %2130 = vmatprep.subr.bf16.mxu0 %v2316_v10  ;;  %v2149_v27 = vpack.c.bf16 %v1880_v25, %v1879_v24  ;;  %v1684_v24 = vld [vmem:[%s2807_s15] sm:$0xff]  ;;  %v1685_v25 = vld [vmem:[%s2807_s15 + $0x8] sm:$0xff] }
 0x15f   : > { %2132 = vmatpush3.bf16.msra.mxu0 %v2131_v29 }
 0x160   : > { %2133 = vmatprep.subr.bf16.mxu0 %v2316_v10 }
 0x162   : > { %1995 = vmatmul.mubr.msk.f32.vlgmr.msra.gmra.mrb[2].mxu0 %vm547_vm0, %v2502_v26 }
 0x163   : > { %2135 = vmatpush3.bf16.msra.mxu0 %v2134_v32  ;;  %2005 = vmatprep.mubr.msk.f32.mxu0 %vm2317_vm1, %v2318_v14  ;;  %v1875_v32 = vld [vmem:[%s2796_s4 + $0x1] ss:$0 sm:$0xff] }
 0x164   : > { %2136 = vmatprep.subr.bf16.mxu0 %v2316_v10 }
 0x167   : > { %2138 = vmatpush3.bf16.msra.mxu0 %v2137_v35 }
 0x168   : > { %2008 = vmatprep.subr.mxu0 %v2318_v14 }
 0x16a   : > { %2006 = vmatmul.mubr.msk.f32.vlgmr.msra.gmra.mrb[4].mxu0 %vm547_vm0, %v2502_v26 }
 0x16b   : > { %2010 = vmatprep.mubr.msk.f32.mxu0 %vm2317_vm1, %v2318_v14 }
 0x22d   : > { %v662_v36 = vpop.f32.mrb[0].mxu0 }
 0x22e   : > { %v1985_v37 = vpop.f32.mrb[1].mxu0  ;;  %v663_v46 = vadd.f32 %v1861_v42, %v662_v36 }
 0x235   : > { %v743_v39 = vpop.f32.mrb[2].mxu0 }
 0x236   : > { %v744_v43 = vadd.f32 %v1863_v38, %v743_v39  ;;  %v1996_v44 = vpop.f32.mrb[3].mxu0 }
 0x238   : > { %2009 = vmatpush3.xpose.msk.msra.mxu0 %vm828_vm2, %v744_v43 }
 0x239   : > { %2139 = vmatprep.subr.bf16.mxu0 %v2316_v10 }
 0x23b   : > { %2011 = vmatmul.mubr.msk.f32.vlgmr.msra.gmra.mrb[6].mxu0 %vm828_vm2, %v663_v46 }
 0x23c   : > { %2141 = vmatpush3.bf16.msra.mxu0 %v2140_v45  ;;  %2026 = vmatprep.mubr.msk.f32.mxu0 %vm2317_vm1, %v2318_v14 }
 0x23d   : > { %v824_v51 = vpop.f32.mrb[4].mxu0  ;;  %2142 = vmatprep.subr.bf16.mxu0 %v2316_v10 }
 0x23e   : > { %v825_v54 = vadd.f32 %v1865_v49, %v824_v51  ;;  %v2007_v55 = vpop.f32.mrb[5].mxu0  ;;  %v2158_v49 = vpack.c.bf16 %v1895_v48, %v1894_v47  ;;  %v992_v51 = vld [vmem:[%s2801_s9] sm:$0xff] }
 0x23f   : > { %v1901_v48 = vld [vmem:[%s2806_s14] ss:$0 sm:$0xff] }
 0x240   : > { %2014 = vmatpush3.msra.mxu1 %v825_v54  ;;  %2144 = vmatpush3.bf16.msra.mxu0 %v2143_v50  ;;  %v2161_v54 = vpack.c.bf16 %v993_v52, %v992_v51 }
 0x241   : > { %2151 = vmatprep.subr.bf16.mxu0 %v2316_v10  ;;  %2145 = vmatprep.subr.bf16.mxu1 %v2316_v10 }
 0x243   : > { %2027 = vmatmul.mubr.msk.f32.vlgmr.msra.gmra.mrb[8].mxu0 %vm547_vm0, %v2502_v26 }
 0x244   : > { %2153 = vmatpush3.bf16.msra.mxu0 %v2152_v56  ;;  %2048 = vmatprep.mubr.msk.f32.mxu0 %vm2317_vm1, %v2318_v14 }
 0x245   : > { %2154 = vmatprep.subr.bf16.mxu0 %v2316_v10 }
 0x248   : > { %2156 = vmatpush3.bf16.msra.mxu0 %v2155_v59 }
 0x249   : > { %2157 = vmatprep.subr.bf16.mxu0 %v2316_v10 }
 0x24b   : > { %2049 = vmatmul.mubr.msk.f32.vlgmr.msra.gmra.mrb[10].mxu0 %vm547_vm0, %v2502_v26 }
 0x24c   : > { %2065 = vmatprep.mubr.msk.f32.mxu0 %vm2317_vm1, %v2318_v14  ;;  %2159 = vmatpush3.bf16.msra.mxu0 %v2158_v49 }
 0x24d   : > { %2163 = vmatprep.subr.bf16.mxu0 %v2316_v10 }
 0x30e   : > { %v901_v63 = vpop.f32.mrb[6].mxu0 }
 0x30f   : > { %v905_v3 = vmul.f32 0.25, %v901_v63  ;;  %v2012_v4 = vpop.f32.mrb[7].mxu0  ;;  %v1898_v63 = vld [vmem:[%s2802_s10] ss:$0 sm:$0xff] }
 0x311   : > { %v906_v5 = vadd.f32 %v905_v3, %v581_v2 }
 0x313   : > { %v908_v6 = vsel %vm907_vm4, %v906_v5, -inf }
 0x314   : > { %909 = vmax.xlane.f32.xlu1 %v908_v6 }
 0x316   : > { %v1073_v7 = vpop.f32.mrb[8].mxu0 }
 0x317   : > { %v2028_v8 = vpop.f32.mrb[9].mxu0  ;;  %v1074_v35 = vadd.f32 %v1875_v32, %v1073_v7  ;;  %v1689_v32 = vld [vmem:[%s2807_s15 + $0x28] sm:$0xff] }
 0x318   : > { %v1592_v8 = vld [vmem:[%s2805_s13] sm:$0xff] }
 0x31e   : > { %v1239_v9 = vpop.f32.mrb[10].mxu0 }
 0x31f   : > { %v2050_v11 = vpop.f32.mrb[11].mxu0 }
 0x320   : > { %v1594_v11 = vld [vmem:[%s2805_s13 + $0x10] sm:$0xff] }
 0x3a1   : > { %v910_v12 = vpop.xlane.xlu1 %909 }
 0x3a2   : > { %v911_v13 = vsub.f32 %v906_v5, %v910_v12  ;;  %v1595_v12 = vld [vmem:[%s2805_s13 + $0x18] sm:$0xff] }
 0x3a4   : > { %v912_v15 = vmul.f32 1.442695, %v911_v13  ;;  %v2167_v13 = vpack.c.bf16 %v1595_v12, %v1594_v11 }
 0x3a6   : > { %2238 = vpow2.f32 %v912_v15 }
 0x3b0   : > { %v2239_v16 = vpop.eup %2238 }
 0x3b1   : > { %v914_v17 = vsel %vm907_vm4, %v2239_v16, 0.0 }
 0x3b2   : > { %915 = vadd.xlane.f32.xlu1 %v914_v17 }
 0x43f   : > { %v916_v18 = vpop.xlane.xlu1 %915 }
 0x440   : > { %2240 = vrcp.f32 %v916_v18 }
 0x44a   : > { %v2241_v21 = vpop.eup %2240 }
 0x44b   : > { %v918_v23 = vmul.f32 %v2241_v21, %v2239_v16  ;;  %v1900_v21 = vld [vmem:[%s2804_s12] ss:$0 sm:$0xff] }
 0x44d   : > { %2016 = vmatmul.mubr.msk.f32.vlgmr.msra.gmra.mrb[0].mxu1 %vm907_vm4, %v918_v23 }
 0x44e   : > { %2147 = vmatpush3.bf16.msra.mxu1 %v2146_v22  ;;  %2037 = vmatprep.mubr.msk.f32.mxu1 %vm2317_vm1, %v2318_v14 }
 0x44f   : > { %2148 = vmatprep.subr.bf16.mxu1 %v2316_v10 }
 0x452   : > { %2150 = vmatpush3.bf16.msra.mxu1 %v2149_v27  ;;  %v2170_v27 = vpack.c.bf16 %v1685_v25, %v1684_v24 }
 0x453   : > { %2051 = vmatprep.subr.mxu1 %v2318_v14 }
 0x455   : > { %2038 = vmatmul.mubr.msk.f32.vlgmr.msra.gmra.mrb[2].mxu1 %vm547_vm0, %v2502_v26  ;;  %v1889_v26 = vld [vmem:[%s2800_s8 + $0x1] ss:$0 sm:$0xff] }
 0x456   : > { %2053 = vmatprep.mubr.msk.f32.mxu1 %vm2317_vm1, %v2318_v14  ;;  %v1240_v36 = vadd.f32 %v1889_v26, %v1239_v9  ;;  %v1691_v26 = vld [vmem:[%s2807_s15 + $0x38] sm:$0xff] }
 0x520   : > { %v988_v28 = vpop.f32.mrb[0].mxu1 }
 0x521   : > { %v2017_v29 = vpop.f32.mrb[1].mxu1 }
 0x522   : > { %v1687_v29 = vld [vmem:[%s2807_s15 + $0x18] sm:$0xff] }
 0x528   : > { %v1156_v31 = vpop.f32.mrb[2].mxu1 }
 0x529   : > { %v1157_v33 = vadd.f32 %v1882_v30, %v1156_v31  ;;  %v2039_v34 = vpop.f32.mrb[3].mxu1  ;;  %v1688_v31 = vld [vmem:[%s2807_s15 + $0x20] sm:$0xff] }
 0x52a   : > { %v1690_v34 = vld [vmem:[%s2807_s15 + $0x30] sm:$0xff] }
 0x52b   : > { %2052 = vmatpush3.xpose.msk.msra.mxu1 %vm828_vm2, %v1157_v33  ;;  %v2176_v33 = vpack.c.bf16 %v1689_v32, %v1688_v31 }
 0x52c   : > { %2056 = vmatprep.subr.mxu1 %v2318_v14 }
 0x52e   : > { %2054 = vmatmul.mubr.msk.f32.vlgmr.msra.gmra.mrb[4].mxu1 %vm828_vm2, %v1074_v35  ;;  %v2179_v35 = vpack.c.bf16 %v1691_v26, %v1690_v34 }
 0x52f   : > { %2057 = vmatpush3.msra.mxu1 %v1240_v36  ;;  %2058 = vmatprep.mubr.msk.f32.mxu1 %vm2317_vm1, %v2318_v14  ;;  %v1692_v36 = vld [vmem:[%s2807_s15 + $0x40] sm:$0xff] }
 0x530   : > { %2160 = vmatprep.subr.bf16.mxu1 %v2316_v10 }
 0x601   : > { %v1315_v37 = vpop.f32.mrb[4].mxu1 }
 0x602   : > { %v1319_v38 = vmul.f32 0.25, %v1315_v37  ;;  %v2055_v39 = vpop.f32.mrb[5].mxu1  ;;  %v1693_v37 = vld [vmem:[%s2807_s15 + $0x48] sm:$0xff] }
 0x603   : > { %v1694_v39 = vld [vmem:[%s2807_s15 + $0x50] sm:$0xff] }
 0x604   : > { %v1320_v40 = vadd.f32 %v1319_v38, %v581_v2  ;;  %v2182_v38 = vpack.c.bf16 %v1693_v37, %v1692_v36 }
 0x606   : > { %v1321_v41 = vsel %vm907_vm4, %v1320_v40, -inf }
 0x607   : > { %1322 = vmax.xlane.f32.xlu0 %v1321_v41 }
 0x694   : > { %v1323_v42 = vpop.xlane.xlu0 %1322 }
 0x695   : > { %v1324_v43 = vsub.f32 %v1320_v40, %v1323_v42  ;;  %v1695_v40 = vld [vmem:[%s2807_s15 + $0x58] sm:$0xff]  ;;  %v1696_v42 = vld [vmem:[%s2807_s15 + $0x60] sm:$0xff] }
 0x696   : > { %v2185_v41 = vpack.c.bf16 %v1695_v40, %v1694_v39 }
 0x697   : > { %v1325_v44 = vmul.f32 1.442695, %v1324_v43  ;;  %v1697_v43 = vld [vmem:[%s2807_s15 + $0x68] sm:$0xff] }
 0x699   : > { %2242 = vpow2.f32 %v1325_v44  ;;  %v2188_v44 = vpack.c.bf16 %v1697_v43, %v1696_v42 }
 0x6a3   : > { %v2243_v45 = vpop.eup %2242 }
 0x6a4   : > { %v1327_v46 = vsel %vm907_vm4, %v2243_v45, 0.0 }
 0x6a5   : > { %1328 = vadd.xlane.f32.xlu1 %v1327_v46  ;;  %v1699_v46 = vld [vmem:[%s2807_s15 + $0x78] sm:$0xff] }
 0x732   : > { %v1329_v50 = vpop.xlane.xlu1 %1328 }
 0x733   : > { %2244 = vrcp.f32 %v1329_v50 }
 0x73d   : > { %v2245_v53 = vpop.eup %2244 }
 0x73e   : > { %v1331_v55 = vmul.f32 %v2245_v53, %v2243_v45  ;;  %v1698_v45 = vld [vmem:[%s2807_s15 + $0x70] sm:$0xff] }
 0x73f   : > { %v2191_v47 = vpack.c.bf16 %v1699_v46, %v1698_v45 }
 0x740   : > { %2059 = vmatmul.mubr.msk.f32.vlgmr.msra.gmra.mrb[6].mxu1 %vm907_vm4, %v1331_v55 }
 0x741   : > { %2162 = vmatpush3.bf16.msra.mxu1 %v2161_v54  ;;  %2072 = vmatprep.mubr.msk.f32.mxu1 %vm2317_vm1, %v2318_v14 }
 0x742   : > { %2169 = vmatprep.subr.bf16.mxu1 %v2316_v10 }
 0x744   : > { %2073 = vmatmul.mubr.msk.f32.vlgmr.msra.gmra.mrb[8].mxu1 %vm828_vm2, %v988_v28  ;;  %v1686_v28 = vld [vmem:[%s2807_s15 + $0x10] sm:$0xff] }
 0x745   : > { %2118 = vmatprep.mubr.msk.f32.mxu1 %vm2317_vm1, %v2318_v14  ;;  %2171 = vmatpush3.bf16.msra.mxu1 %v2170_v27  ;;  %v2173_v30 = vpack.c.bf16 %v1687_v29, %v1686_v28 }
 0x746   : > { %2172 = vmatprep.subr.bf16.mxu1 %v2316_v10 }
 0x749   : > { %2174 = vmatpush3.bf16.msra.mxu1 %v2173_v30 }
 0x74a   : > { %2175 = vmatprep.subr.bf16.mxu1 %v2316_v10 }
 0x74d   : > { %2177 = vmatpush3.bf16.msra.mxu1 %v2176_v33 }
 0x74e   : > { %2178 = vmatprep.subr.bf16.mxu1 %v2316_v10 }
 0x751   : > { %2180 = vmatpush3.bf16.msra.mxu1 %v2179_v35 }
 0x752   : > { %2181 = vmatprep.subr.bf16.mxu1 %v2316_v10 }
 0x755   : > { %2183 = vmatpush3.bf16.msra.mxu1 %v2182_v38 }
 0x756   : > { %2184 = vmatprep.subr.bf16.mxu1 %v2316_v10 }
 0x759   : > { %2186 = vmatpush3.bf16.msra.mxu1 %v2185_v41 }
 0x75a   : > { %2187 = vmatprep.subr.bf16.mxu1 %v2316_v10 }
 0x75d   : > { %2189 = vmatpush3.bf16.msra.mxu1 %v2188_v44 }
 0x75e   : > { %2190 = vmatprep.subr.bf16.mxu1 %v2316_v10 }
 0x761   : > { %2192 = vmatpush3.bf16.msra.mxu1 %v2191_v47 }
 0x813   : > { %v1401_v56 = vpop.f32.mrb[6].mxu1 }
 0x814   : > { %v2060_v57 = vpop.f32.mrb[7].mxu1  ;;  %2066 = vmatmul.mubr.msk.f32.vlgmr.msra.gmra.mrb[12].mxu0 %vm828_vm2, %v1401_v56 }
 0x815   : > { %2083 = vmatprep.mubr.msk.f32.mxu0 %vm2317_vm1, %v2318_v14 }
 0x817   : > { %v1550_v58 = vpop.f32.mrb[8].mxu1 }
 0x818   : > { %v2074_v59 = vpop.f32.mrb[9].mxu1 }
 0x8e7   : > { %v1477_v60 = vpop.f32.mrb[12].mxu0 }
 0x8e8   : > { %v1551_v61 = vadd.f32 %v1550_v58, %v1477_v60  ;;  %v2067_v62 = vpop.f32.mrb[13].mxu0  ;;  %v1904_v58 = vld [vmem:[%s2808_s16] ss:$0 sm:$0xff] }
 0x8ea   : > { %v1554_v1 = vadd.f32 %v1551_v61, %v2464_v0  ;;  %v1593_v0 = vld [vmem:[%s2805_s13 + $0x8] sm:$0xff] }
 0x8eb   : > { %v2164_v9 = vpack.c.bf16 %v1593_v0, %v1592_v8 }
 0x8ec   : > { %v2656_v2 = vadd.f32 %v1898_v63, %v1554_v1 }
 0x8ed   : > { %2165 = vmatpush3.bf16.msra.mxu0 %v2164_v9 }
 0x8ee   : > { %v1565_v3 = vsel %vm547_vm0, %v2656_v2, 0.0  ;;  %2166 = vmatprep.subr.bf16.mxu0 %v2316_v10 }
 0x8ef   : > { %1566 = vadd.xlane.f32.xlu0 %v1565_v3 }
 0x8f1   : > { %2168 = vmatpush3.bf16.msra.mxu0 %v2167_v13 }
 0x97c   : > { %v1567_v4 = vpop.xlane.xlu0 %1566 }
 0x97d   : > { %v1568_v5 = vmul.f32 0.03125, %v1567_v4 }
 0x97f   : > { %v1569_v14 = vsub.f32 %v2656_v2, %v1568_v5 }
 0x981   : > { %v1570_v6 = vmul.f32 %v1569_v14, %v1569_v14 }
 0x983   : > { %v1571_v7 = vsel %vm547_vm0, %v1570_v6, 0.0 }
 0x984   : > { %1572 = vadd.xlane.f32.xlu1 %v1571_v7 }
 0xa11   : > { %v1573_v15 = vpop.xlane.xlu1 %1572 }
 0xa12   : > { %v1574_v16 = vmul.f32 0.03125, %v1573_v15 }
 0xa14   : > { %v1575_v17 = vadd.f32 1e-05, %v1574_v16 }
 0xa16   : > { %2246 = vrsqrt.f32 %v1575_v17 }
 0xa20   : > { %v2247_v18 = vpop.eup %2246 }
 0xa21   : > { %v1577_v20 = vmul.f32 %v2247_v18, %v1569_v14 }
 0xa23   : > { %v1584_v22 = vmul.f32 %v1899_v19, %v1577_v20 }
 0xa25   : > { %v1591_v23 = vadd.f32 %v1900_v21, %v1584_v22 }
 0xa27   : > { %2084 = vmatmul.mubr.msk.f32.vlgmr.msra.gmra.mrb[14].mxu0 %vm547_vm0, %v1591_v23 }
 0xafa   : > { %v1672_v49 = vpop.f32.mrb[14].mxu0 }
 0xafb   : > { %v1673_v50 = vadd.f32 %v1901_v48, %v1672_v49  ;;  %v2085_v51 = vpop.f32.mrb[15].mxu0 }
 0xafd   : > { %v1903_v10 = vmul.f32 -1.702, %v1673_v50 }
 0xaff   : > { %v1678_v52 = vmul.f32 1.442695, %v1903_v10 }
 0xb01   : > { %2248 = vpow2.f32 %v1678_v52 }
 0xb0b   : > { %v2249_v53 = vpop.eup %2248 }
 0xb0c   : > { %v1680_v54 = vadd.f32 1.0, %v2249_v53 }
 0xb0e   : > { %2250 = vrcp.f32 %v1680_v54 }
 0xb18   : > { %v2251_v55 = vpop.eup %2250 }
 0xb19   : > { %v1683_v56 = vmul.f32 %v2251_v55, %v1673_v50 }
 0xb1b   : > { %2119 = vmatmul.mubr.f32.vlgmr.msra.gmra.mrb[10].mxu1 %v1683_v56 }
 0xbee   : > { %v1766_v57 = vpop.f32.mrb[10].mxu1 }
 0xbef   : > { %v1770_v59 = vadd.f32 %v1766_v57, %v2656_v2  ;;  %v2120_v60 = vpop.f32.mrb[11].mxu1 }
 0xbf1   : > { %v1778_v61 = vadd.f32 %v1904_v58, %v1770_v59 }
 0xbf3   : > { %1779 = vst.msk [vmem:[%s539_s30] sm:$0xff] %vm547_vm0, %v1778_v61 }
 0xbf4   : > { %2265 = shalt.err (!%p2262_p3)
}
 0xbf5   : > { %s2266_s0 = scalar_lea.hbm %s2749_s21, 128  ;;  %s2270_s26 = scalar_lea.hbm %s2809_s17, 256 }
 0xbf6   : > { %p2267_p4 = scmp.ne.s32.totalorder %s2749_s21, %s2266_s0  ;;  %p2271_p9 = scmp.lt.u32.totalorder %s2749_s21, %s2809_s17 }
 0xbf7   : > { %p2272_p10 = scmp.lt.u32.totalorder %s2270_s26, %s2266_s0  ;;  %p2274_p12 = scmp.lt.u32.totalorder %s2266_s0, %s2749_s21 }
 0xbf8   : > { %p2268_p7 = pnand %p2267_p4, %p2449_p5 }
 0xbf9   : > { %p2273_p11 = por %p2272_p10, %p2271_p9 }
 0xbfa   : > { %p2269_p8 = pneg %p2268_p7 }
 0xbfb   : > { %p2275_p13 = por %p2274_p12, %p2273_p11 }
 0xbfd   : > { %p2276_p0 = pnand %p2275_p13, %p2269_p8 }
 0xbff   : > { %2279 = shalt.err (!%p2276_p0)
}
 0xc00   : > { %2193 = dma.vmem_to_hbm [thread:$0]  (%p2449_p5), %s2751_s18, 128, %s2749_s21, %s1781_s20  }
 0xc01 PF: > { %p2199_p1 = scmp.ge.s32.totalorder %s2314_s27, 2  ;;  %s1806_s28 = sand.u32 1, %s2302_s24  }
 0xc02   : > { %s1807_s22 = scalar_lea.sflag [#allocation3], %s1806_s28 }
 0xc03   : > { %p2196_p2 = pnand %p2199_p1, %p2453_p6 }
 0xc05   : > { %2297 = dma.done.wait (!%p2196_p2), %s1807_s22, 128  }
 0xc06   : > { %2299 = vsyncadd (!%p2196_p2), %s1807_s22, 4294967168  ;;  %s2827_s27 = sld [smem:[#allocation6_spill]]  ;;  %s2828_s0 = sld [smem:[#allocation5_spill]] }
 0xc07   : > { %s2829_s26 = sld [smem:[#allocation7_spill]]  ;;  %s2830_s24 = smov %s2306_s25 }
 0xc0c   : > { %p27_p3 = scmp.ge.s32.totalorder %s2827_s27, 4   ;;  %s2831_s25 = smov %s2828_s0 }
 0xc0e   :  { %29 = sbr.rel (!%p27_p3) target bundleno = 7 (0x7), region = 130 }
 0xc15   :  { %1812 = vsyncpa [#allocation3], 1 }
 0xc16   :  { %1814 = vsyncpa [#allocation3 + $0x1], 1 }

</bundles_post_ra>
